<compile_context>
chip_gen: v5e
topology: v5e:2x2
jax: 0.10.0
libtpu: 0.0.40
codegen_flags: <defaults>
</compile_context>

<pallas_src>
import jax
import jax.numpy as jnp
from jax.experimental import pallas as pl
from jax.experimental.pallas import tpu as pltpu


def _pos_enc_kernel(x_ref, pos_ref, o_ref):
    # x_ref:   (Bt, M) tile of the input
    # pos_ref: (1,  M) positional embedding (constant block -> fetched once)
    # o_ref:   (Bt, M) output tile
    # Broadcast over the batch (sublane) dim; pure VPU add.
    o_ref[...] = (x_ref[...] + pos_ref[...]).astype(o_ref.dtype)


def _pick_batch_tile(B: int, row_bytes: int, target_tile_bytes: int) -> int:
    """Choose Bt so the x tile is ~target_tile_bytes, respecting (8,128) tiling."""
    bt = max(1, target_tile_bytes // max(1, row_bytes))
    if bt >= B or B <= 8:
        # Block dim equal to the full array dim is always legal.
        return B
    # Keep the sublane dim a multiple of 8 for clean tiling.
    bt = (bt // 8) * 8
    return max(8, min(bt, B))


def positional_encoding(
    x: jax.Array,
    pos_embed: jax.Array,
    *,
    target_tile_bytes: int = 2 * 1024 * 1024,
) -> jax.Array:
    """x: (B, N, D); pos_embed: (1, N, D). Returns x + pos_embed (broadcast over B)."""
    B, N, D = x.shape
    assert pos_embed.shape == (1, N, D), pos_embed.shape
    M = N * D

    # Lane-dense layout: last dim = N*D so stores are wide, unmasked vst.
    x2 = x.reshape(B, M)
    # Compute/store in x's dtype (matches PyTorch's result dtype for the module).
    pos2 = pos_embed.reshape(1, M).astype(x.dtype)

    row_bytes = M * x2.dtype.itemsize
    bt = _pick_batch_tile(B, row_bytes, target_tile_bytes)
    grid = (pl.cdiv(B, bt),)

    out2 = pl.pallas_call(
        _pos_enc_kernel,
        out_shape=jax.ShapeDtypeStruct((B, M), x.dtype),
        grid=grid,
        in_specs=[
            # Bt batch rows per grid step.
            pl.BlockSpec((bt, M), lambda b: (b, 0)),
            # Positional embedding: constant block index -> DMA'd only once.
            pl.BlockSpec((1, M), lambda b: (0, 0)),
        ],
        out_specs=pl.BlockSpec((bt, M), lambda b: (b, 0)),
        compiler_params=pltpu.CompilerParams(
            dimension_semantics=("parallel",),
        ),
    )(x2, pos2)

    return out2.reshape(B, N, D)


if __name__ == "__main__":
    # Small shapes consistent with the module: batch=2, num_patches=8, embed_dim=32
    B, N, D = 2, 8, 32
    key = jax.random.PRNGKey(0)
    kx, kp = jax.random.split(key)

    x = jax.random.normal(kx, (B, N, D), dtype=jnp.float32)
    # nn.Parameter(torch.zeros(...)) is all zeros at init; use small random
    # values here so the add is actually visible in the correctness check.
    pos_embed = 0.01 * jax.random.normal(kp, (1, N, D), dtype=jnp.float32)

    out = positional_encoding(x, pos_embed)
    out = jax.block_until_ready(out)

    ref = x + pos_embed
    assert out.shape == (B, N, D)
    assert jnp.allclose(out, ref, atol=1e-6, rtol=1e-6)

    print("KERNEL_OK")
</pallas_src>

<mosaic_0001>
module attributes {stable_mosaic.version = 11 : i64} {
  func.func @_pos_enc_kernel(%arg0: i32, %arg1: memref<2x256xf32, #tpu.memory_space<vmem>>, %arg2: memref<1x256xf32, #tpu.memory_space<vmem>>, %arg3: memref<2x256xf32, #tpu.memory_space<vmem>>) attributes {dimension_semantics = [#tpu.dimension_semantics<parallel>], iteration_bounds = array<i64: 1>, scalar_prefetch = 0 : i64, scratch_operands = 0 : i64, tpu.core_type = #tpu.core_type<tc>, window_params = [{transform_indices = @transform_0, window_bounds = array<i64: 2, 256>}, {pipeline_mode = #tpu.pipeline_mode<synchronous>, transform_indices = @transform_1, window_bounds = array<i64: 1, 256>}, {transform_indices = @transform_2, window_bounds = array<i64: 2, 256>}]} {
    %c0 = arith.constant 0 : index
    %c0_0 = arith.constant 0 : index
    %0 = vector.load %arg1[%c0, %c0_0] : memref<2x256xf32, #tpu.memory_space<vmem>>, vector<2x256xf32>
    %c0_1 = arith.constant 0 : index
    %c0_2 = arith.constant 0 : index
    %1 = vector.load %arg2[%c0_1, %c0_2] : memref<1x256xf32, #tpu.memory_space<vmem>>, vector<1x256xf32>
    %2 = vector.broadcast %1 : vector<1x256xf32> to vector<2x256xf32>
    %3 = arith.addf %0, %2 : vector<2x256xf32>
    %c0_3 = arith.constant 0 : index
    %c0_4 = arith.constant 0 : index
    %4 = vector.load %arg3[%c0_3, %c0_4] : memref<2x256xf32, #tpu.memory_space<vmem>>, vector<2x256xf32>
    tpu.vector_store %arg3[%c0_3, %c0_4], %3 {strides = array<i32>} : memref<2x256xf32, #tpu.memory_space<vmem>>, vector<2x256xf32>,
    return
  }
  func.func @transform_0(%arg0: i32) -> (i32, i32) {
    %c0_i32 = arith.constant 0 : i32
    %c0_i32_0 = arith.constant 0 : i32
    return %arg0, %c0_i32 : i32, i32
  }
  func.func @transform_1(%arg0: i32) -> (i32, i32) {
    %c0_i32 = arith.constant 0 : i32
    %c0_i32_0 = arith.constant 0 : i32
    %c0_i32_1 = arith.constant 0 : i32
    return %c0_i32, %c0_i32_0 : i32, i32
  }
  func.func @transform_2(%arg0: i32) -> (i32, i32) {
    %c0_i32 = arith.constant 0 : i32
    %c0_i32_0 = arith.constant 0 : i32
    return %arg0, %c0_i32 : i32, i32
  }
}

</mosaic_0001>

<bundles_post_ra>
// kernel: tpu_custom_call.1
= control target key start
LH: loop header
LB: loop body
LE: loop exit
PB: predicated region body
PF: predicated region fallthrough
CT: control target
= control target key end

     0   :  { %7 = vsyncpa [#allocation3], 0  ;;  %s177_s0 = inlined_call_operand.hbm [shape: f32[2,256], index: 0, kind: input, shape index: {}]   ;;  %s178_s1 = inlined_call_operand.hbm [shape: f32[1,256], index: 1, kind: input, shape index: {}]   ;;  %s179_s2 = inlined_call_operand.hbm [shape: f32[2,256], index: 2, kind: output, shape index: {}]  }
   0x1   :  { %8 = vsyncpa [#allocation6], 0 }
   0x2   :  { %9 = vsyncpa [#allocation4], 0  ;;  %s15_s11 = sshll.u32 %s177_s0, 4  ;;  %s150_s12 = smov [#allocation2]   ;;  %s16_s11 = int_to_ptr.hbm [resolvable:$true] %s15_s11 }
   0x3   :  { %s17_s13 = sshll.u32 %s150_s12, 4  ;;  %s26_s16 = sshll.u32 %s178_s1, 4  ;;  %s18_s13 = int_to_ptr.vmem [resolvable:$true] %s17_s13  ;;  %s27_s16 = int_to_ptr.hbm [resolvable:$true] %s26_s16 }
   0x4   :  { %20 = dma.hbm_to_vmem [thread:$0]  %s16_s11, 64, %s18_s13, [#allocation3]  }
   0x5   :  { %s151_s17 = smov [#allocation5]  }
   0x6   :  { %s28_s18 = sshll.u32 %s151_s17, 4  ;;  %s29_s18 = int_to_ptr.vmem [resolvable:$true] %s28_s18 }
   0x7   :  { %31 = dma.hbm_to_vmem [thread:$0]  %s27_s16, 32, %s29_s18, [#allocation6]  }
   0x8   :  { %144 = dma.done.wait [#allocation3], 64  }
   0x9   :  { %145 = vsyncadd [#allocation3], 4294967232 }
   0xa   :  { %146 = dma.done.wait [#allocation6], 32  }
   0xb   :  { %147 = vsyncadd [#allocation6], 4294967264  ;;  %v41_v0 = vld [vmem:[#allocation5] sm:$0x3]  ;;  %vm46_vm0 = vcmask 1041408   ;;  %s152_s0 = smov [#allocation7]  }
   0xc   :  { %v43_v1 = vperm.slane %v41_v0, 0  ;;  %v44_v2 = vperm.slane %v41_v0, 1  ;;  %v40_v3 = vld [vmem:[#allocation2] sm:$0xf]  ;;  %s56_s19 = sshll.u32 %s152_s0, 4  ;;  %s58_s21 = sshll.u32 %s179_s2, 4  ;;  %s57_s19 = int_to_ptr.vmem [resolvable:$true] %s56_s19  ;;  %s59_s21 = int_to_ptr.hbm [resolvable:$true] %s58_s21 }
   0xe   :  { %v45_v4 = vrot.slane %v44_v2, 6 }
  0x10   :  { %v47_v5 = vsel %vm46_vm0, %v43_v1, %v45_v4 }
  0x11   :  { %v49_v6 = vadd.f32 %v47_v5, %v40_v3 }
  0x13   :  { %50 = vst [vmem:[#allocation7] sm:$0xf] %v49_v6 }
  0x14   :  { %61 = dma.vmem_to_hbm [thread:$0]  %s57_s19, 64, %s59_s21, [#allocation4]  }
  0x15   :  { %148 = dma.done.wait [#allocation4], 64  }
  0x16   :  { %149 = vsyncadd [#allocation4], 4294967232 }
  0x17   :  { %66 = vsyncpa [#allocation3], 1 }
  0x18   :  { %67 = vsyncpa [#allocation6], 1 }
  0x19   :  { %68 = vsyncpa [#allocation4], 1 }

</bundles_post_ra>
